<compile_context>
chip_gen: v5e
topology: v5e:2x2
jax: 0.10.0
libtpu: 0.0.40
codegen_flags: <defaults>
</compile_context>

<pallas_src>
import functools

import jax
import jax.numpy as jnp
from jax.experimental import pallas as pl
from jax.experimental.pallas import tpu as pltpu


# ----------------------------------------------------------------------------
# Hardware-aware sizing helpers
# ----------------------------------------------------------------------------
def _vmem_capacity_bytes():
    """Per-core VMEM capacity; conservative default if the query fails."""
    try:
        cap = int(pltpu.get_tpu_info().vmem_capacity_bytes)
        if cap > 0:
            return cap
    except Exception:
        pass
    return 64 << 20  # v7x-sized (smallest current generation) -> conservative


def _cdiv(a, b):
    return -(-a // b)


def _choose_batch_tile(batch, bytes_per_batch, budget_bytes, prefer_even_grid):
    """Largest batch tile whose x block fits the per-buffer budget.

    Does not require Bt | B (partial tail block is handled by Pallas).  On
    small-VMEM parts (v7x: 2 TensorCores) prefer an even grid extent so both
    cores get work.
    """
    bt = int(max(1, min(batch, budget_bytes // bytes_per_batch)))
    if prefer_even_grid:
        grid = _cdiv(batch, bt)
        if grid % 2 == 1 and grid < batch:
            bt = max(1, _cdiv(batch, grid + 1))  # smaller tile -> still fits
    return bt


# ----------------------------------------------------------------------------
# Kernels
# ----------------------------------------------------------------------------
def _se_fused_kernel(x_ref, w1_ref, w2_ref, o_ref, *, inv_hw):
    # x_ref : (Bt, C, HW)  batch tile, channels on sublanes, spatial on lanes
    # w1_ref: (Cr, C)      fc1.weight, PyTorch (out, in) layout (no transpose)
    # w2_ref: (C, Cr)      fc2.weight, PyTorch (out, in) layout (no transpose)
    # o_ref : (Bt, C, HW)
    x = x_ref[...]

    # Squeeze: global average pool over the spatial lane axis, f32 accumulation
    # without materializing an f32 copy of the whole tile.
    pooled = jnp.sum(x, axis=-1, dtype=jnp.float32) * inv_hw            # (Bt, C)

    # Excitation: tiny MXU matmuls in f32.  Contract on the "in" axis so the
    # PyTorch (out, in) weight layout is used as-is (x @ W.T semantics).
    h = jax.lax.dot_general(pooled, w1_ref[...].astype(jnp.float32),
                            (((1,), (1,)), ((), ())),
                            preferred_element_type=jnp.float32)          # (Bt, Cr)
    h = jnp.maximum(h, 0.0)
    y = jax.lax.dot_general(h, w2_ref[...].astype(jnp.float32),
                            (((1,), (1,)), ((), ())),
                            preferred_element_type=jnp.float32)          # (Bt, C)
    gate = jax.nn.sigmoid(y).astype(x.dtype)                             # (Bt, C)

    # Scale: broadcast per-(batch, channel) gate over the spatial lanes.  Runs
    # at the input width (bf16 on v6e/v7x stays bf16).
    o_ref[...] = (x * gate[:, :, None]).astype(o_ref.dtype)


def _pool_kernel(x_ref, pooled_ref, *, inv_hw):
    # x_ref: (1, Ct, HW) -> pooled_ref: (1, Ct, 1) f32
    pooled_ref[...] = (jnp.sum(x_ref[...], axis=-1, keepdims=True,
                               dtype=jnp.float32) * inv_hw)


def _rescale_kernel(x_ref, gate_ref, o_ref):
    # x_ref: (1, Ct, HW), gate_ref: (1, Ct, 1)
    o_ref[...] = (x_ref[...] * gate_ref[...]).astype(o_ref.dtype)


# ----------------------------------------------------------------------------
# Wrappers
# ----------------------------------------------------------------------------
def _se_fallback(x, fc1_w, fc2_w, hw, budget_bytes, clamp_hi):
    """Channel-tiled two-pass path for when one batch element exceeds budget."""
    B, C, HW = x.shape
    itemsize = jnp.dtype(x.dtype).itemsize

    if C <= 8:
        Ct = C
    else:
        Ct = max(8, min(C, (budget_bytes // max(HW * itemsize, 1)) // 8 * 8))
    n_cb = _cdiv(C, Ct)
    grid = (B, n_cb)

    blk = Ct * HW * itemsize
    # TODO(synk): pathological C*HW where even an 8-channel slab exceeds VMEM
    # would need spatial tiling on top of this; not expected for SE shapes.
    vmem_limit = int(min(max(4 * blk + (4 << 20), 32 << 20), clamp_hi))
    cparams = pltpu.CompilerParams(
        dimension_semantics=("parallel", "parallel"),
        vmem_limit_bytes=vmem_limit,
    )

    pooled = pl.pallas_call(
        functools.partial(_pool_kernel, inv_hw=1.0 / hw),
        out_shape=jax.ShapeDtypeStruct((B, C, 1), jnp.float32),
        grid_spec=pltpu.PrefetchScalarGridSpec(
            num_scalar_prefetch=0,
            grid=grid,
            in_specs=[pl.BlockSpec((1, Ct, HW), lambda b, c: (b, c, 0))],
            out_specs=pl.BlockSpec((1, Ct, 1), lambda b, c: (b, c, 0)),
        ),
        compiler_params=cparams,
    )(x)

    # Tiny excitation MLP on (B, C): negligible FLOPs next to the x stream, so
    # it is computed in plain JAX between the two bandwidth-bound passes.
    p = pooled.reshape(B, C)
    h = jnp.maximum(p @ fc1_w.astype(jnp.float32).T, 0.0)
    gate = jax.nn.sigmoid(h @ fc2_w.astype(jnp.float32).T)
    gate = gate.astype(x.dtype).reshape(B, C, 1)

    out = pl.pallas_call(
        _rescale_kernel,
        out_shape=jax.ShapeDtypeStruct((B, C, HW), x.dtype),
        grid_spec=pltpu.PrefetchScalarGridSpec(
            num_scalar_prefetch=0,
            grid=grid,
            in_specs=[
                pl.BlockSpec((1, Ct, HW), lambda b, c: (b, c, 0)),
                pl.BlockSpec((1, Ct, 1), lambda b, c: (b, c, 0)),
            ],
            out_specs=pl.BlockSpec((1, Ct, HW), lambda b, c: (b, c, 0)),
        ),
        compiler_params=cparams,
    )(x, gate)
    return out


def se_block(x_nchw, fc1_w, fc2_w, *, block_budget_bytes=None):
    """SEBlock forward.

    x_nchw: (B, C, H, W); fc1_w: (Cr, C); fc2_w: (C, Cr) — PyTorch nn.Linear
    (out_features, in_features) layout, bias-free as in the reference module.
    """
    B, C, H, W = x_nchw.shape
    Cr = fc1_w.shape[0]
    HW = H * W

    # Free view: channels on sublanes, flattened spatial on lanes.  No pad /
    # slice: full-extent last two block dims are exempt from the (8,128) rule;
    # a non-128 HW only costs a masked tail store.
    # (A (B, HW, C) layout for small HW / large C would require a wrapper-side
    #  transpose == an extra HBM pass, so it is intentionally not done here.)
    x = x_nchw.reshape(B, C, HW)

    vmem_cap = _vmem_capacity_bytes()
    if block_budget_bytes is None:
        # ~16 MiB x blocks on 128-MiB-VMEM parts (v5e/v6e), ~8 MiB on v7x.
        block_budget_bytes = (16 << 20) if vmem_cap >= (96 << 20) else (8 << 20)
    clamp_hi = min(100 << 20, (vmem_cap * 3) // 4)

    itemsize = jnp.dtype(x.dtype).itemsize
    bytes_per_batch = C * HW * itemsize

    if bytes_per_batch > block_budget_bytes:
        out = _se_fallback(x, fc1_w, fc2_w, HW, block_budget_bytes, clamp_hi)
        return out.reshape(B, C, H, W)

    prefer_even = vmem_cap < (96 << 20)  # v7x-like: 2 TensorCores share grid
    Bt = _choose_batch_tile(B, bytes_per_batch, block_budget_bytes, prefer_even)
    grid = (_cdiv(B, Bt),)

    blk_bytes = Bt * bytes_per_batch
    w_bytes = (fc1_w.size + fc2_w.size) * jnp.dtype(fc1_w.dtype).itemsize
    # 2 double-buffered x blocks + 2 output blocks + weight buffers + slack.
    vmem_limit = int(min(max(4 * blk_bytes + 4 * w_bytes + (4 << 20), 32 << 20),
                         clamp_hi))

    kernel = functools.partial(_se_fused_kernel, inv_hw=1.0 / HW)

    out = pl.pallas_call(
        kernel,
        out_shape=jax.ShapeDtypeStruct((B, C, HW), x.dtype),
        grid_spec=pltpu.PrefetchScalarGridSpec(
            num_scalar_prefetch=0,
            grid=grid,
            in_specs=[
                pl.BlockSpec((Bt, C, HW), lambda b: (b, 0, 0)),
                # Constant index_map -> fetched once, not per step.
                pl.BlockSpec((Cr, C), lambda b: (0, 0)),
                pl.BlockSpec((C, Cr), lambda b: (0, 0)),
            ],
            out_specs=pl.BlockSpec((Bt, C, HW), lambda b: (b, 0, 0)),
        ),
        compiler_params=pltpu.CompilerParams(
            dimension_semantics=("parallel",),
            vmem_limit_bytes=vmem_limit,
        ),
    )(x, fc1_w, fc2_w)

    return out.reshape(B, C, H, W)


def se_block_ref(x_nchw, fc1_w, fc2_w):
    # Pure-JAX reference mirroring the PyTorch module (bias=False Linears).
    y = jnp.mean(x_nchw, axis=(2, 3))                 # (B, C)
    y = jnp.maximum(y @ fc1_w.T, 0.0)                 # (B, Cr)
    y = jax.nn.sigmoid(y @ fc2_w.T)                   # (B, C)
    return x_nchw * y[:, :, None, None]


if __name__ == "__main__":
    key = jax.random.PRNGKey(0)
    kx, k1, k2, kx2 = jax.random.split(key, 4)

    B, C, H, W = 2, 64, 16, 16
    reduction = 16
    Cr = C // reduction

    x = jax.random.normal(kx, (B, C, H, W), dtype=jnp.float32)
    # Deterministic synthetic weights in PyTorch nn.Linear (out, in) layout.
    fc1_w = jax.random.normal(k1, (Cr, C), dtype=jnp.float32) * 0.1
    fc2_w = jax.random.normal(k2, (C, Cr), dtype=jnp.float32) * 0.1

    # 1) Main fused path.
    out = jax.block_until_ready(se_block(x, fc1_w, fc2_w))
    ref = jax.block_until_ready(se_block_ref(x, fc1_w, fc2_w))
    assert out.shape == (B, C, H, W)
    assert jnp.allclose(out, ref, atol=1e-5, rtol=1e-5)

    # 2) Ragged spatial extent (7x7 -> HW=49, non-128 lane tail, no pad/slice).
    x7 = jax.random.normal(kx2, (2, C, 7, 7), dtype=jnp.float32)
    out7 = jax.block_until_ready(se_block(x7, fc1_w, fc2_w))
    ref7 = jax.block_until_ready(se_block_ref(x7, fc1_w, fc2_w))
    assert jnp.allclose(out7, ref7, atol=1e-5, rtol=1e-5)

    # 3) Force the channel-tiled fallback path (tiny per-block budget).
    out_fb = jax.block_until_ready(
        se_block(x, fc1_w, fc2_w, block_budget_bytes=32 << 10))
    assert jnp.allclose(out_fb, ref, atol=1e-5, rtol=1e-5)

    # 4) Non-divisor batch tile (B=3, partial tail block via cdiv grid).
    x3 = jax.random.normal(kx2, (3, C, 7, 7), dtype=jnp.float32)
    out3 = jax.block_until_ready(
        se_block(x3, fc1_w, fc2_w, block_budget_bytes=2 * C * 49 * 4))
    ref3 = jax.block_until_ready(se_block_ref(x3, fc1_w, fc2_w))
    assert jnp.allclose(out3, ref3, atol=1e-5, rtol=1e-5)

    print("KERNEL_OK")
</pallas_src>

<mosaic_0001>
module attributes {stable_mosaic.version = 11 : i64} {
  func.func @_se_fused_kernel(%arg0: i32, %arg1: memref<1x64x256xf32, #tpu.memory_space<vmem>>, %arg2: memref<4x64xf32, #tpu.memory_space<vmem>>, %arg3: memref<64x4xf32, #tpu.memory_space<vmem>>, %arg4: memref<1x64x256xf32, #tpu.memory_space<vmem>>) attributes {dimension_semantics = [#tpu.dimension_semantics<parallel>], iteration_bounds = array<i64: 2>, scalar_prefetch = 0 : i64, scratch_operands = 0 : i64, tpu.core_type = #tpu.core_type<tc>, window_params = [{transform_indices = @transform_0, window_bounds = array<i64: 1, 64, 256>}, {pipeline_mode = #tpu.pipeline_mode<synchronous>, transform_indices = @transform_1, window_bounds = array<i64: 4, 64>}, {pipeline_mode = #tpu.pipeline_mode<synchronous>, transform_indices = @transform_2, window_bounds = array<i64: 64, 4>}, {transform_indices = @transform_3, window_bounds = array<i64: 1, 64, 256>}]} {
    %c0 = arith.constant 0 : index
    %c0_0 = arith.constant 0 : index
    %c0_1 = arith.constant 0 : index
    %0 = vector.load %arg1[%c0, %c0_0, %c0_1] : memref<1x64x256xf32, #tpu.memory_space<vmem>>, vector<1x64x256xf32>
    %cst = arith.constant dense<0.000000e+00> : vector<1x64xf32>
    %1 = vector.multi_reduction <add>, %0, %cst [2] : vector<1x64x256xf32> to vector<1x64xf32>
    %cst_2 = arith.constant 3.906250e-03 : f32
    %2 = vector.broadcast %cst_2 : f32 to vector<1x64xf32>
    %3 = arith.mulf %1, %2 : vector<1x64xf32>
    %c0_3 = arith.constant 0 : index
    %c0_4 = arith.constant 0 : index
    %4 = vector.load %arg2[%c0_3, %c0_4] : memref<4x64xf32, #tpu.memory_space<vmem>>, vector<4x64xf32>
    %cst_5 = arith.constant dense<0.000000e+00> : vector<1x4xf32>
    %5 = tpu.matmul %3, %4, %cst_5 {dimension_numbers = #tpu.dot_dimension_numbers<[1], [1], [0], [0], [0, 0, 1, 0], [], []>} : vector<1x64xf32>, vector<4x64xf32>, vector<1x4xf32> -> vector<1x4xf32>
    %cst_6 = arith.constant 0.000000e+00 : f32
    %6 = vector.broadcast %cst_6 : f32 to vector<1x4xf32>
    %7 = arith.maximumf %5, %6 : vector<1x4xf32>
    %c0_7 = arith.constant 0 : index
    %c0_8 = arith.constant 0 : index
    %8 = vector.load %arg3[%c0_7, %c0_8] : memref<64x4xf32, #tpu.memory_space<vmem>>, vector<64x4xf32>
    %cst_9 = arith.constant dense<0.000000e+00> : vector<1x64xf32>
    %9 = tpu.matmul %7, %8, %cst_9 {dimension_numbers = #tpu.dot_dimension_numbers<[1], [1], [0], [0], [0, 0, 1, 0], [], []>} : vector<1x4xf32>, vector<64x4xf32>, vector<1x64xf32> -> vector<1x64xf32>
    %10 = arith.negf %9 : vector<1x64xf32>
    %11 = math.exp %10 : vector<1x64xf32>
    %cst_10 = arith.constant 1.000000e+00 : f32
    %12 = vector.broadcast %cst_10 : f32 to vector<1x64xf32>
    %13 = arith.addf %12, %11 : vector<1x64xf32>
    %14 = arith.divf %12, %13 : vector<1x64xf32>
    %15 = vector.shape_cast %14 : vector<1x64xf32> to vector<1x64x1xf32>
    %16 = vector.broadcast %15 : vector<1x64x1xf32> to vector<1x64x256xf32>
    %17 = arith.mulf %0, %16 : vector<1x64x256xf32>
    %c0_11 = arith.constant 0 : index
    %c0_12 = arith.constant 0 : index
    %c0_13 = arith.constant 0 : index
    %18 = vector.load %arg4[%c0_11, %c0_12, %c0_13] : memref<1x64x256xf32, #tpu.memory_space<vmem>>, vector<1x64x256xf32>
    tpu.vector_store %arg4[%c0_11, %c0_12, %c0_13], %17 {strides = array<i32>} : memref<1x64x256xf32, #tpu.memory_space<vmem>>, vector<1x64x256xf32>,
    return
  }
  func.func @transform_0(%arg0: i32) -> (i32, i32, i32) {
    %c0_i32 = arith.constant 0 : i32
    %c0_i32_0 = arith.constant 0 : i32
    %c0_i32_1 = arith.constant 0 : i32
    return %arg0, %c0_i32, %c0_i32_0 : i32, i32, i32
  }
  func.func @transform_1(%arg0: i32) -> (i32, i32) {
    %c0_i32 = arith.constant 0 : i32
    %c0_i32_0 = arith.constant 0 : i32
    %c0_i32_1 = arith.constant 0 : i32
    return %c0_i32, %c0_i32_0 : i32, i32
  }
  func.func @transform_2(%arg0: i32) -> (i32, i32) {
    %c0_i32 = arith.constant 0 : i32
    %c0_i32_0 = arith.constant 0 : i32
    %c0_i32_1 = arith.constant 0 : i32
    return %c0_i32, %c0_i32_0 : i32, i32
  }
  func.func @transform_3(%arg0: i32) -> (i32, i32, i32) {
    %c0_i32 = arith.constant 0 : i32
    %c0_i32_0 = arith.constant 0 : i32
    %c0_i32_1 = arith.constant 0 : i32
    return %arg0, %c0_i32, %c0_i32_0 : i32, i32, i32
  }
}

</mosaic_0001>

<bundles_post_ra>
// kernel: tpu_custom_call.1
= control target key start
LH: loop header
LB: loop body
LE: loop exit
PB: predicated region body
PF: predicated region fallthrough
CT: control target
= control target key end

     0   :  { %8 = vsyncpa [#allocation3], 0  ;;  %s1016_s0 = inlined_call_operand.hbm [shape: f32[2,64,256], index: 0, kind: input, shape index: {}]   ;;  %s1017_s1 = inlined_call_operand.vmem [shape: f32[4,64], index: 1, kind: input, shape index: {}]   ;;  %s1018_s2 = inlined_call_operand.vmem [shape: f32[64,4], index: 2, kind: input, shape index: {}]   ;;  %s1019_s3 = inlined_call_operand.hbm [shape: f32[2,64,256], index: 3, kind: output, shape index: {}]  }
   0x1   :  { %10 = vsyncpa [#allocation3 + $0x1], 0 }
   0x2   :  { %11 = vsyncpa [#allocation4], 0 }
   0x3   :  { %13 = vsyncpa [#allocation4 + $0x1], 0  ;;  %s764_s12 = smov 0   ;;  %s766_s13 = smov 0  }
   0x4   :  { %s768_s14 = smov 0   ;;  %s770_s15 = smov 0  }
   0x5 LB: > { %s785_s16 = sadd.s32 4294967295, %s738_s15   ;;  %s551_s17 = sadd.s32 4294967294, %s738_s15   ;;  %s738_s15 = sphi %s770_s15, %s1029_s15   ;;  %s734_s14 = sphi %s768_s14, %s1028_s14   ;;  %s730_s13 = sphi %s766_s13, %s1027_s13   ;;  %s726_s12 = sphi %s764_s12, %s1026_s12  }
   0x6   : > { %s789_s18 = sadd.s32 1, %s738_s15   ;;  %s26_s19 = sadd.s32 1, %s734_s14 }
   0x7   : > { %s23_s20 = ssub.s32 %s738_s15, %s789_s18  ;;  %p33_p0 = scmp.ne.s32.totalorder %s734_s14, %s730_s13 }
   0x8   : > { %p24_p1 = scmp.eq.s32.totalorder %s23_s20, 0  ;;  %p34_p2 = scmp.eq.s32.totalorder %s738_s15, 0 }
   0x9   : > { %p39_p3 = scmp.ne.s32.totalorder %s730_s13, %s726_s12  ;;  %p40_p4 = scmp.eq.s32.totalorder %s785_s16, 0 }
   0xa   : > { %s801_s21 = scalar_select %p24_p1, %s734_s14, %s26_s19  }
   0xb   : > { %p803_p5 = por %p34_p2, %p33_p0  ;;  %p807_p6 = por %p40_p4, %p39_p3 }
   0xc   : > { %p105_p7 = scmp.eq.s32.totalorder %s785_s16, 1  ;;  %p111_p8 = scmp.eq.s32.totalorder %s551_s17, 1 }
   0xd   : > { %p591_p10 = scmp.lt.s32.totalorder %s738_s15, 2  ;;  %s137_s26 = sand.u32 1, %s734_s14  }
   0xe   : > { %p814_p11 = por %p105_p7, %p33_p0  ;;  %p818_p12 = por %p111_p8, %p39_p3 }
   0xf   : > { %s577_s27 = sshll.u32 %s738_s15, 7  ;;  %s554_s28 = sshll.u32 %s137_s26, 7 }
  0x10   : > { %s146_s4 = scalar_lea.hbm %s1016_s0, %s577_s27  ;;  %s141_s6 = scalar_lea.vmem [#allocation2], %s554_s28 }
  0x11   : > { %s147_s5 = sshll.u32 %s146_s4, 4  ;;  %s149_s7 = sshll.u32 %s141_s6, 4  ;;  %s148_s5 = int_to_ptr.hbm [resolvable:$true] %s147_s5  ;;  %s150_s7 = int_to_ptr.vmem [resolvable:$true] %s149_s7 }
  0x12   : > { %p829_p13 = pnand %p591_p10, %p803_p5  ;;  %p557_p0 = scmp.ge.s32.totalorder %s738_s15, 1 }
  0x13   : > { %p157_p1 = scmp.lt.s32.totalorder %s738_s15, 3  ;;  %s138_s9 = scalar_lea.sflag [#allocation3], %s137_s26 }
  0x14   : > { %s642_s10 = sshra.s32 %s148_s5, 4  ;;  %p646_p3 = pneg %p829_p13  ;;  %s643_s10 = int_to_ptr.hbm [resolvable:$true] %s642_s10 }
  0x15   : > { %s644_s11 = scalar_lea.hbm %s643_s10, 128  ;;  %s649_s20 = scalar_lea.hbm %s1016_s0, 256 }
  0x16   : > { %p645_p2 = scmp.ne.s32.totalorder %s643_s10, %s644_s11  ;;  %p650_p5 = scmp.lt.s32.totalorder %s643_s10, %s1016_s0 }
  0x17   : > { %p651_p8 = scmp.lt.s32.totalorder %s649_s20, %s644_s11 }
  0x18   : > { %p647_p4 = pnand %p646_p3, %p645_p2 }
  0x19   : > { %p652_p10 = por %p651_p8, %p650_p5 }
  0x1a   : > { %p648_p7 = pneg %p647_p4 }
  0x1c   : > { %p653_p9 = pnand %p652_p10, %p648_p7 }
  0x1e   : > { %656 = shalt.err (!%p653_p9)
}
  0x1f   : > { %s740_s26 = smov 256   ;;  %s741_s28 = smov 16  }
  0x20   : > { %586 = dma.hbm_to_vmem [thread:$0]  (!%p829_p13), %s148_s5, 2048, %s150_s7, %s138_s9, %s740_s26, %s740_s26, %s741_s28  }
  0x21   : > { %p158_p2 = pnand %p557_p0, %p157_p1 }
  0x22   : > { %s850_s29 = sand.u32 (!%p158_p2), 1, %s730_s13  }
  0x23   : > { %161 = sbr.rel (%p158_p2) target bundleno = 620 (0x26c), region = 32  ;;  %s558_s30 = sshll.u32 (!%p158_p2), %s850_s29, 7 }
  0x24   : > { %s164_s4 = scalar_lea.sflag (!%p158_p2), [#allocation3], %s850_s29  ;;  %s167_s6 = scalar_lea.vmem (!%p158_p2), [#allocation2], %s558_s30 }
  0x28   : > { %717 = dma.done.wait (%p807_p6), %s164_s4, 2048  }
  0x29   : > { %719 = vsyncadd (%p807_p6), %s164_s4, 4294965248  ;;  %v860_v0 = vld [vmem:[%s167_s6] sm:$0xff]  ;;  %v862_v1 = vld [vmem:[%s167_s6 + $0x8] sm:$0xff]  ;;  %vm279_vm0 = vcmask 523264   ;;  %vm314_vm1 = vcmask 31744   ;;  %v248_v28 = vlaneseq  ;;  %vm253_vm2 = vcmask 130112  }
  0x2a   : > { %v864_v2 = vld [vmem:[%s167_s6 + $0x20] sm:$0xff]  ;;  %v207_v3 = vadd.f32 %v862_v1, %v860_v0  ;;  %v868_v4 = vld [vmem:[%s167_s6 + $0x28] sm:$0xff]  ;;  %v878_v9 = vld [vmem:[%s167_s6 + $0x10] sm:$0xff]  ;;  %vm257_vm3 = vcmask 195712   ;;  %vm261_vm4 = vcmask 261312   ;;  %vm265_vm5 = vcmask 326912  }
  0x2b   : > { %v870_v5 = vld [vmem:[%s167_s6 + $0x40] sm:$0xff]  ;;  %v872_v6 = vld [vmem:[%s167_s6 + $0x48] sm:$0xff]  ;;  %v213_v7 = vadd.f32 %v868_v4, %v864_v2  ;;  %v880_v10 = vld [vmem:[%s167_s6 + $0x18] sm:$0xff]  ;;  %v249_v33 = vand.u32 127, %v248_v28  ;;  %vm269_vm6 = vcmask 392512   ;;  %vm273_vm7 = vcmask 458112  }
  0x2c   : > { %v219_v8 = vadd.f32 %v872_v6, %v870_v5  ;;  %208 = vadd.xlane.f32.xlu0 %v207_v3  ;;  %v882_v11 = vld [vmem:[%s167_s6 + $0x30] sm:$0xff]  ;;  %v884_v12 = vld [vmem:[%s167_s6 + $0x38] sm:$0xff]  ;;  %v210_v15 = vadd.f32 %v880_v10, %v878_v9  ;;  %v896_v18 = vld [vmem:[%s167_s6 + $0x60] sm:$0xff]  ;;  %vm277_vm8 = vcmask 523712   ;;  %s950_s7 = scalar_lea.vmem [#allocation5], %s558_s30  ;;  %s578_s30 = sshll.u32 %s785_s16, 7 }
  0x2d   : > { %214 = vadd.xlane.f32.xlu1 %v213_v7  ;;  %v886_v13 = vld [vmem:[%s167_s6 + $0x50] sm:$0xff]  ;;  %v888_v14 = vld [vmem:[%s167_s6 + $0x58] sm:$0xff]  ;;  %v216_v16 = vadd.f32 %v884_v12, %v882_v11  ;;  %v898_v19 = vld [vmem:[%s167_s6 + $0x68] sm:$0xff]  ;;  %v251_v36 = vadd.s32 4294967288, %v249_v33  ;;  %v255_v37 = vadd.s32 4294967280, %v249_v33  ;;  %v259_v40 = vadd.s32 4294967272, %v249_v33  ;;  %s474_s10 = scalar_lea.hbm %s1019_s3, %s578_s30 }
  0x2e   : > { %220 = vadd.xlane.f32.xlu2 %v219_v8  ;;  %v222_v17 = vadd.f32 %v888_v14, %v886_v13  ;;  %v900_v20 = vld [vmem:[%s167_s6 + $0x70] sm:$0xff]  ;;  %v902_v21 = vld [vmem:[%s167_s6 + $0x78] sm:$0xff]  ;;  %v225_v22 = vadd.f32 %v898_v19, %v896_v18  ;;  %v239_v24 = vld [vmem:[%s1017_s1] sm:$0xf]  ;;  %v263_v45 = vadd.s32 4294967264, %v249_v33  ;;  %v267_v52 = vadd.s32 4294967256, %v249_v33 }
  0x2f   : > { %v228_v23 = vadd.f32 %v902_v21, %v900_v20  ;;  %560 = vmatpush.xpose.msk.msra.mxu0 %vm279_vm0, %v239_v24  ;;  %v313_v25 = vld [vmem:[%s1018_s2 + $0x38] sm:$0xff]  ;;  %v312_v26 = vld [vmem:[%s1018_s2 + $0x30] sm:$0xff]  ;;  %v311_v27 = vld [vmem:[%s1018_s2 + $0x28] sm:$0xff]  ;;  %v271_v59 = vadd.s32 4294967248, %v249_v33  ;;  %v275_v62 = vadd.s32 4294967240, %v249_v33  ;;  %s475_s11 = sshll.u32 %s950_s7, 4  ;;  %s476_s11 = int_to_ptr.vmem [resolvable:$true] %s475_s11 }
  0x30   : > { %562 = vmatpush.xpose.msk.msra.mxu1 %vm314_vm1, %v313_v25  ;;  %v310_v32 = vld [vmem:[%s1018_s2 + $0x20] sm:$0xff]  ;;  %v309_v34 = vld [vmem:[%s1018_s2 + $0x18] sm:$0xff]  ;;  %v308_v44 = vld [vmem:[%s1018_s2 + $0x10] sm:$0xff]  ;;  %s477_s17 = sshll.u32 %s474_s10, 4  ;;  %s463_s16 = scalar_lea.sflag [#allocation4], %s850_s29  ;;  %s478_s17 = int_to_ptr.hbm [resolvable:$true] %s477_s17 }
  0x31   : > { %v307_v55 = vld [vmem:[%s1018_s2 + $0x8] sm:$0xff]  ;;  %v306_v24 = vld [vmem:[%s1018_s2] sm:$0xff]  ;;  %s686_s19 = sshra.s32 %s478_s17, 4  ;;  %s692_s26 = scalar_lea.hbm %s1019_s3, 256  ;;  %s687_s19 = int_to_ptr.hbm [resolvable:$true] %s686_s19 }
  0x32   : > { %s688_s20 = scalar_lea.hbm %s687_s19, 128  ;;  %p693_p0 = scmp.lt.s32.totalorder %s687_s19, %s1019_s3 }
  0x33   : > { %p689_p6 = scmp.ne.s32.totalorder %s687_s19, %s688_s20  ;;  %p694_p1 = scmp.lt.s32.totalorder %s692_s26, %s688_s20 }
  0x34   : > { %211 = vadd.xlane.f32.xlu0 %v210_v15  ;;  %563 = vmatpush.xpose.msk.msra.mxu1 %vm314_vm1, %v312_v26 }
  0x35   : > { %217 = vadd.xlane.f32.xlu1 %v216_v16  ;;  %p690_p9 = pnand %p689_p6, %p814_p11  ;;  %p695_p3 = por %p694_p1, %p693_p0 }
  0x36   : > { %223 = vadd.xlane.f32.xlu2 %v222_v17 }
  0x37   : > { %p691_p13 = pneg %p690_p9 }
  0x38   : > { %564 = vmatpush.xpose.msk.msra.mxu1 %vm314_vm1, %v311_v27  ;;  %v383_v27 = vshrl.u32 %v248_v28, 7 }
  0x39   : > { %p696_p4 = pnand %p695_p3, %p691_p13 }
  0x3a   : > { %629 = vset.pattern.permute.xlu2 %v383_v27 }
  0x3c   : > { %226 = vadd.xlane.f32.xlu0 %v225_v22  ;;  %565 = vmatpush.xpose.msk.msra.mxu1 %vm314_vm1, %v310_v32 }
  0x3d   : > { %229 = vadd.xlane.f32.xlu1 %v228_v23 }
  0x40   : > { %566 = vmatpush.xpose.msk.msra.mxu1 %vm314_vm1, %v309_v34 }
  0x44   : > { %567 = vmatpush.xpose.msk.msra.mxu1 %vm314_vm1, %v308_v44 }
  0x48   : > { %568 = vmatpush.xpose.msk.msra.mxu1 %vm314_vm1, %v307_v55 }
  0x4c   : > { %569 = vmatpush.xpose.msk.msra.mxu1 %vm314_vm1, %v306_v24 }
  0x9f   : > { %v209_v29 = vpop.xlane.xlu0 %208 }
  0xa0   : > { %v215_v30 = vpop.xlane.xlu1 %214  ;;  %v231_v35 = vmul.f32 0.00390625, %v209_v29  ;;  %v396_v29 = vadd.s32 16, %v383_v27 }
  0xa1   : > { %v221_v31 = vpop.xlane.xlu2 %220  ;;  %v233_v38 = vmul.f32 0.00390625, %v215_v30  ;;  %v390_v30 = vadd.s32 8, %v383_v27 }
  0xa2   : > { %v250_v47 = vperm.slane %v231_v35, %v249_v33  ;;  %v235_v48 = vmul.f32 0.00390625, %v221_v31  ;;  %631 = vset.pattern.permute.xlu1 %v396_v29 }
  0xa3   : > { %v256_v50 = vperm.slane %v233_v38, %v255_v37  ;;  %630 = vset.pattern.permute.xlu0 %v390_v30 }
  0xa4   : > { %v264_v57 = vperm.slane %v235_v48, %v263_v45  ;;  %v414_v45 = vadd.s32 40, %v383_v27  ;;  %v408_v48 = vadd.s32 32, %v383_v27 }
  0xa7   : > { %v212_v39 = vpop.xlane.xlu0 %211 }
  0xa8   : > { %v232_v41 = vmul.f32 0.00390625, %v212_v39  ;;  %v218_v42 = vpop.xlane.xlu1 %217 }
  0xa9   : > { %v224_v43 = vpop.xlane.xlu2 %223  ;;  %v234_v46 = vmul.f32 0.00390625, %v218_v42 }
  0xaa   : > { %v252_v49 = vperm.slane %v232_v41, %v251_v36  ;;  %v236_v53 = vmul.f32 0.00390625, %v224_v43 }
  0xab   : > { %v260_v51 = vperm.slane %v234_v46, %v259_v40  ;;  %v402_v46 = vadd.s32 24, %v383_v27 }
  0xac   : > { %v254_v54 = vsel %vm253_vm2, %v252_v49, %v250_v47  ;;  %v268_v60 = vperm.slane %v236_v53, %v267_v52  ;;  %v426_v47 = vadd.s32 56, %v383_v27  ;;  %v420_v49 = vadd.s32 48, %v383_v27 }
  0xad   : > { %v258_v56 = vsel %vm257_vm3, %v256_v50, %v254_v54 }
  0xae   : > { %v262_v58 = vsel %vm261_vm4, %v260_v51, %v258_v56 }
  0xaf   : > { %v227_v61 = vpop.xlane.xlu0 %226  ;;  %v266_v7 = vsel %vm265_vm5, %v264_v57, %v262_v58 }
  0xb0   : > { %v237_v63 = vmul.f32 0.00390625, %v227_v61  ;;  %v230_v3 = vpop.xlane.xlu1 %229  ;;  %v270_v17 = vsel %vm269_vm6, %v268_v60, %v266_v7 }
  0xb1   : > { %v238_v8 = vmul.f32 0.00390625, %v230_v3 }
  0xb2   : > { %v272_v15 = vperm.slane %v237_v63, %v271_v59 }
  0xb3   : > { %v276_v16 = vperm.slane %v238_v8, %v275_v62 }
  0xb4   : > { %v274_v22 = vsel %vm273_vm7, %v272_v15, %v270_v17 }
  0xb5   : > { %v278_v23 = vsel %vm277_vm8, %v276_v16, %v274_v22 }
  0xb6   : > { %561 = vmatmul.msk.f32.vlgmr.msra.gmra.mxu0 %vm279_vm0, %v278_v23 }
 0x133   : > { %v302_v25 = vpop.f32.mrf.mxu0 }
 0x134   : > { %v305_v26 = vmax.f32 %v302_v25, 0.0 }
 0x136   : > { %570 = vmatmul.msk.f32.vlgmr.msra.gmra.mxu1 %vm314_vm1, %v305_v26 }
 0x1b3   : > { %v359_v31 = vpop.f32.mrf.mxu1 }
 0x1b4   : > { %v571_v32 = vmul.f32 -1.442695, %v359_v31 }
 0x1b6   : > { %638 = vpow2.f32 %v571_v32 }
 0x1bc   : > { %v639_v33 = vpop.eup %638 }
 0x1bd   : > { %v365_v34 = vadd.f32 1.0, %v639_v33 }
 0x1bf   : > { %640 = vrcp.f32 %v365_v34  ;;  %v377_v38 = vand.u32 2147483648, %v365_v34  ;;  %v375_v40 = vand.u32 2147483647, %v365_v34  ;;  %vm371_vm10 = vweird.f32 %v365_v34 }
 0x1c1   : > { %v378_v28 = vor.u32 1.1754944e-38, %v377_v38  ;;  %vm376_vm12 = vcmp.eq.f32.partialorder %v375_v40, 8.507059e+37 }
 0x1c5   : > { %v641_v35 = vpop.eup %640 }
 0x1c6   : > { %v367_v36 = vmul.f32 %v641_v35, %v365_v34  ;;  %vm372_vm9 = vweird.f32 %v641_v35 }
 0x1c7   : > { %vm373_vm11 = vmor %vm371_vm10, %vm372_vm9 }
 0x1c8   : > { %v368_v37 = vsub.f32 1.0, %v367_v36 }
 0x1ca   : > { %v369_v39 = vmul.f32 %v641_v35, %v368_v37 }
 0x1cc   : > { %v370_v41 = vadd.f32 %v641_v35, %v369_v39 }
 0x1ce   : > { %v374_v42 = vsel %vm373_vm11, %v641_v35, %v370_v41 }
 0x1cf   : > { %v379_v43 = vsel %vm376_vm12, %v378_v28, %v374_v42 }
 0x1d0   : > { %v381_v44 = vperm.slane %v379_v43, 0 }
 0x1d2   : > { %398 = vperm.xlu1 %631, %v381_v44   ;;  %392 = vperm.xlu0 %630, %v381_v44  }
 0x1d3   : > { %386 = vperm.xlu2 %629, %v381_v44  }
 0x1da   : > { %634 = vset.pattern.permute.xlu1 %v414_v45  ;;  %637 = vset.pattern.permute.xlu0 %v426_v47 }
 0x1db   : > { %632 = vset.pattern.permute.xlu2 %v402_v46 }
 0x1e2   : > { %416 = vperm.xlu1 %634, %v381_v44  }
 0x1e3   : > { %404 = vperm.xlu2 %632, %v381_v44  }
 0x1ea   : > { %636 = vset.pattern.permute.xlu1 %v426_v47 }
 0x1eb   : > { %633 = vset.pattern.permute.xlu2 %v408_v48 }
 0x1f2   : > { %428 = vperm.xlu1 %636, %v381_v44  }
 0x1f3   : > { %410 = vperm.xlu2 %633, %v381_v44  }
 0x1fb   : > { %635 = vset.pattern.permute.xlu2 %v420_v49 }
 0x203   : > { %422 = vperm.xlu2 %635, %v381_v44  }
 0x22d   : > { %v387_v50 = vpop.permute.xlu2 %386 }
 0x22e   : > { %v430_v51 = vmul.f32 %v387_v50, %v860_v0  ;;  %v431_v52 = vmul.f32 %v387_v50, %v862_v1 }
 0x230   : > { %446 = vst [vmem:[%s950_s7] sm:$0xff] %v430_v51 }
 0x231   : > { %447 = vst [vmem:[%s950_s7 + $0x8] sm:$0xff] %v431_v52 }
 0x23d   : > { %v405_v53 = vpop.permute.xlu2 %404 }
 0x23e   : > { %v436_v54 = vmul.f32 %v405_v53, %v882_v11  ;;  %v437_v0 = vmul.f32 %v405_v53, %v884_v12 }
 0x240   : > { %452 = vst [vmem:[%s950_s7 + $0x30] sm:$0xff] %v436_v54 }
 0x241   : > { %453 = vst [vmem:[%s950_s7 + $0x38] sm:$0xff] %v437_v0 }
 0x244   : > { %v399_v1 = vpop.permute.xlu1 %398  ;;  %v393_v55 = vpop.permute.xlu0 %392 }
 0x245   : > { %v434_v56 = vmul.f32 %v399_v1, %v864_v2  ;;  %v435_v57 = vmul.f32 %v399_v1, %v868_v4  ;;  %v432_v58 = vmul.f32 %v393_v55, %v878_v9  ;;  %v433_v59 = vmul.f32 %v393_v55, %v880_v10 }
 0x247   : > { %450 = vst [vmem:[%s950_s7 + $0x20] sm:$0xff] %v434_v56 }
 0x248   : > { %451 = vst [vmem:[%s950_s7 + $0x28] sm:$0xff] %v435_v57 }
 0x249   : > { %448 = vst [vmem:[%s950_s7 + $0x10] sm:$0xff] %v432_v58 }
 0x24a   : > { %449 = vst [vmem:[%s950_s7 + $0x18] sm:$0xff] %v433_v59 }
 0x24d   : > { %v411_v11 = vpop.permute.xlu2 %410 }
 0x24e   : > { %v438_v12 = vmul.f32 %v411_v11, %v870_v5  ;;  %v439_v2 = vmul.f32 %v411_v11, %v872_v6 }
 0x250   : > { %454 = vst [vmem:[%s950_s7 + $0x40] sm:$0xff] %v438_v12 }
 0x251   : > { %455 = vst [vmem:[%s950_s7 + $0x48] sm:$0xff] %v439_v2 }
 0x254   : > { %v417_v4 = vpop.permute.xlu1 %416 }
 0x255   : > { %v440_v9 = vmul.f32 %v417_v4, %v886_v13  ;;  %v441_v60 = vmul.f32 %v417_v4, %v888_v14 }
 0x257   : > { %456 = vst [vmem:[%s950_s7 + $0x50] sm:$0xff] %v440_v9 }
 0x258   : > { %457 = vst [vmem:[%s950_s7 + $0x58] sm:$0xff] %v441_v60 }
 0x25d   : > { %v423_v10 = vpop.permute.xlu2 %422 }
 0x25e   : > { %v442_v61 = vmul.f32 %v423_v10, %v896_v18  ;;  %v443_v5 = vmul.f32 %v423_v10, %v898_v19 }
 0x260   : > { %458 = vst [vmem:[%s950_s7 + $0x60] sm:$0xff] %v442_v61 }
 0x261   : > { %459 = vst [vmem:[%s950_s7 + $0x68] sm:$0xff] %v443_v5 }
 0x264   : > { %v429_v6 = vpop.permute.xlu1 %428 }
 0x265   : > { %v444_v13 = vmul.f32 %v429_v6, %v900_v20  ;;  %v445_v14 = vmul.f32 %v429_v6, %v902_v21 }
 0x267   : > { %460 = vst [vmem:[%s950_s7 + $0x70] sm:$0xff] %v444_v13 }
 0x268   : > { %461 = vst [vmem:[%s950_s7 + $0x78] sm:$0xff] %v445_v14 }
 0x269   : > { %699 = shalt.err (!%p696_p4)
}
 0x26a   : > { %s742_s29 = smov 256   ;;  %s743_s6 = smov 16  }
 0x26b   : > { %581 = dma.vmem_to_hbm [thread:$0]  (%p814_p11), %s476_s11, 2048, %s478_s17, %s463_s16, %s742_s29, %s742_s29, %s743_s6  }
 0x26c PF: > { %s492_s23 = sand.u32 1, %s726_s12   ;;  %p1025_p7 = scmp.ge.s32.totalorder %s738_s15, 2 }
 0x26d   : > { %s493_s5 = scalar_lea.sflag [#allocation4], %s492_s23 }
 0x26e   : > { %p588_p5 = pnand %p1025_p7, %p818_p12 }
 0x270   : > { %p589_p8 = pneg %p588_p5 }
 0x272   : > { %721 = dma.done.wait (%p589_p8), %s493_s5, 2048  }
 0x273   : > { %723 = vsyncadd (%p589_p8), %s493_s5, 4294965248  ;;  %p16_p10 = scmp.ge.s32.totalorder %s789_s18, 4   ;;  %s1026_s12 = smov %s730_s13 }
 0x274   : > { %s1027_s13 = smov %s734_s14  ;;  %s1028_s14 = smov %s801_s21 }
 0x275   : > { %s1029_s15 = smov %s789_s18  ;;  %18 = sbr.rel (!%p16_p10) target bundleno = 5 (0x5), region = 77 }
 0x27a   :  { %499 = vsyncpa [#allocation3], 1 }
 0x27b   :  { %501 = vsyncpa [#allocation3 + $0x1], 1 }
 0x27c   :  { %502 = vsyncpa [#allocation4], 1 }
 0x27d   :  { %504 = vsyncpa [#allocation4 + $0x1], 1 }

</bundles_post_ra>
